<compile_context>
chip_gen: v6e
topology: v6e:2x2x1
jax: 0.10.0
libtpu: 0.0.40
codegen_flags: <defaults>
</compile_context>

<pallas_src>
import functools
import math

import jax
import jax.numpy as jnp
from jax.experimental import pallas as pl
from jax.experimental.pallas import tpu as pltpu

EPS = 1e-5
TM, TN, TK = 256, 256, 256   # MXU-friendly default tiles; bounded VMEM (fits v7x)


def _round_up(x, m):
    return ((x + m - 1) // m) * m


# --------------------------- tiled matmul kernel -----------------------------

def _mm_kernel(a_ref, b_ref, scale_ref, shift_ref, *rest, relu, has_res):
    if has_res:
        res_ref, o_ref, acc_ref = rest
    else:
        o_ref, acc_ref = rest
    k = pl.program_id(2)

    @pl.when(k == 0)
    def _():
        acc_ref[...] = jnp.zeros_like(acc_ref)

    acc_ref[...] += jnp.dot(a_ref[...], b_ref[...],
                            preferred_element_type=jnp.float32)

    @pl.when(k == pl.num_programs(2) - 1)
    def _():
        out = acc_ref[...] * scale_ref[...] + shift_ref[...]
        if has_res:
            out = out + res_ref[...].astype(jnp.float32)
        if relu:
            out = jnp.maximum(out, 0.0)
        o_ref[...] = out.astype(o_ref.dtype)


def matmul_scale_shift(a, b, scale, shift, *, relu=False, residual=None,
                       out_dtype=jnp.bfloat16):
    """[M,K] @ [K,N] (bf16 inputs, f32 accumulation) with a fused per-column
    scale/shift (+ optional residual add + ReLU) epilogue."""
    M, K = a.shape
    K2, N = b.shape
    assert K == K2
    has_res = residual is not None

    # Adaptive tiles: MXU-friendly 256 tiles for big dims, padded-up small dims otherwise.
    tm = TM if M >= TM else _round_up(M, 16)
    tn = TN if N >= TN else _round_up(N, 128)
    tk = TK if K >= TK else _round_up(K, 128)
    Mp, Np, Kp = _round_up(M, tm), _round_up(N, tn), _round_up(K, tk)

    a = a.astype(jnp.bfloat16)
    b = b.astype(jnp.bfloat16)
    if (Mp, Kp) != (M, K):
        a = jnp.pad(a, ((0, Mp - M), (0, Kp - K)))
    if (Kp, Np) != (K, N):
        b = jnp.pad(b, ((0, Kp - K), (0, Np - N)))
    scale = jnp.pad(scale.reshape(1, N).astype(jnp.float32), ((0, 0), (0, Np - N)))
    shift = jnp.pad(shift.reshape(1, N).astype(jnp.float32), ((0, 0), (0, Np - N)))

    inputs = [a, b, scale, shift]
    in_specs = [
        pl.BlockSpec((tm, tk), lambda i, j, k: (i, k)),
        pl.BlockSpec((tk, tn), lambda i, j, k: (k, j)),
        pl.BlockSpec((1, tn), lambda i, j, k: (0, j)),
        pl.BlockSpec((1, tn), lambda i, j, k: (0, j)),
    ]
    if has_res:
        r = residual.astype(jnp.bfloat16)
        if (Mp, Np) != (M, N):
            r = jnp.pad(r, ((0, Mp - M), (0, Np - N)))
        inputs.append(r)
        in_specs.append(pl.BlockSpec((tm, tn), lambda i, j, k: (i, j)))

    grid = (Mp // tm, Np // tn, Kp // tk)
    out_bytes = jnp.dtype(out_dtype).itemsize
    # double-buffered input/output tiles + f32 accumulator (well under v7x's 64 MiB VMEM)
    tile_bytes = (2 * (tm * tk + tk * tn + 2 * tn) * 2
                  + 2 * tm * tn * out_bytes
                  + (2 * tm * tn * 2 if has_res else 0)
                  + tm * tn * 4)
    vmem_limit = int(min(48 * 1024 * 1024, max(16 * 1024 * 1024, 4 * tile_bytes)))
    cost = pl.CostEstimate(
        flops=2 * Mp * Np * Kp,
        transcendentals=0,
        bytes_accessed=int(Mp * Kp * 2 * grid[1] + Kp * Np * 2 * grid[0]
                           + Mp * Np * out_bytes))

    out = pl.pallas_call(
        functools.partial(_mm_kernel, relu=relu, has_res=has_res),
        out_shape=jax.ShapeDtypeStruct((Mp, Np), out_dtype),
        grid=grid,
        in_specs=in_specs,
        out_specs=pl.BlockSpec((tm, tn), lambda i, j, k: (i, j)),
        scratch_shapes=[pltpu.VMEM((tm, tn), jnp.float32)],
        compiler_params=pltpu.CompilerParams(
            dimension_semantics=("parallel", "parallel", "arbitrary"),
            vmem_limit_bytes=vmem_limit),
        cost_estimate=cost,
    )(*inputs)
    if (Mp, Np) != (M, N):
        out = out[:M, :N]
    return out


# ----------------------------- reduction kernels -----------------------------

def _max_axis1_kernel(x_ref, o_ref):
    o_ref[...] = jnp.max(x_ref[...].astype(jnp.float32), axis=1).astype(o_ref.dtype)


def max_over_axis1(x):  # [M, R, C] -> [M, C]
    M, R, C = x.shape
    return pl.pallas_call(
        _max_axis1_kernel,
        out_shape=jax.ShapeDtypeStruct((M, C), x.dtype),
        grid=(1,),
        in_specs=[pl.BlockSpec((M, R, C), lambda i: (0, 0, 0))],
        out_specs=pl.BlockSpec((M, C), lambda i: (0, 0)),
    )(x)


def _mean_axis1_kernel(x_ref, o_ref):
    s = jnp.sum(x_ref[...].astype(jnp.float32), axis=1)
    o_ref[...] = (s * (1.0 / x_ref.shape[1])).astype(o_ref.dtype)


def mean_over_axis1(x):  # [M, R, C] -> [M, C]  (global average pool)
    M, R, C = x.shape
    return pl.pallas_call(
        _mean_axis1_kernel,
        out_shape=jax.ShapeDtypeStruct((M, C), x.dtype),
        grid=(1,),
        in_specs=[pl.BlockSpec((M, R, C), lambda i: (0, 0, 0))],
        out_specs=pl.BlockSpec((M, C), lambda i: (0, 0)),
    )(x)


# --------------------------------- LSTM --------------------------------------

def _lstm_kernel(xproj_ref, whhT_ref, out_ref, h_sc, c_sc):
    t = pl.program_id(0)

    @pl.when(t == 0)
    def _():
        h_sc[...] = jnp.zeros_like(h_sc)
        c_sc[...] = jnp.zeros_like(c_sc)

    H = h_sc.shape[-1]
    gates = xproj_ref[0] + jnp.dot(h_sc[...], whhT_ref[...],
                                   preferred_element_type=jnp.float32)
    i = jax.nn.sigmoid(gates[:, 0:H])
    f = jax.nn.sigmoid(gates[:, H:2 * H])
    g = jnp.tanh(gates[:, 2 * H:3 * H])
    o = jax.nn.sigmoid(gates[:, 3 * H:4 * H])
    c = f * c_sc[...] + i * g
    h = o * jnp.tanh(c)
    c_sc[...] = c
    h_sc[...] = h
    out_ref[0, :, :] = h


def lstm_forward(x_tbd, p):
    """PyTorch nn.LSTM (1 layer, bias=True, h0=c0=0). x: [T, B, D] -> [T, B, H].
    Hidden is padded to 128 lanes, batch to 8 sublanes (lane-dense stores);
    the padding is mathematically inert and sliced off at the end."""
    T, B, D = x_tbd.shape
    H, Hp = p['hidden'], p['hidden_pad']
    Bp = _round_up(B, 8)
    x = x_tbd
    if Bp != B:
        x = jnp.pad(x, ((0, 0), (0, Bp - B), (0, 0)))
    # input projection (+ both biases) for all timesteps at once
    ones = jnp.ones((4 * Hp,), jnp.float32)
    xproj = matmul_scale_shift(x.reshape(T * Bp, D), p['W_ih_T'],
                               ones, p['b'], relu=False, out_dtype=jnp.float32)
    xproj = xproj.reshape(T, Bp, 4 * Hp)
    out = pl.pallas_call(
        _lstm_kernel,
        out_shape=jax.ShapeDtypeStruct((T, Bp, Hp), jnp.float32),
        grid=(T,),
        in_specs=[pl.BlockSpec((1, Bp, 4 * Hp), lambda t: (t, 0, 0)),
                  pl.BlockSpec((Hp, 4 * Hp), lambda t: (0, 0))],
        out_specs=pl.BlockSpec((1, Bp, Hp), lambda t: (t, 0, 0)),
        scratch_shapes=[pltpu.VMEM((Bp, Hp), jnp.float32),
                        pltpu.VMEM((Bp, Hp), jnp.float32)],
        compiler_params=pltpu.CompilerParams(
            dimension_semantics=("arbitrary",)),
    )(xproj, p['W_hh_T'])
    return out[:, :B, :H]


# ------------------------------ JAX glue ------------------------------------

def extract_patches(x, kh, kw, stride, pad, pad_value=0.0):
    """x: [N, H, W, C] -> ([N, Ho, Wo, kh*kw*C], Ho, Wo), column order (ky, kx, ci)."""
    N, H, W, C = x.shape
    Ho = (H + 2 * pad - kh) // stride + 1
    Wo = (W + 2 * pad - kw) // stride + 1
    xp = jnp.pad(x, ((0, 0), (pad, pad), (pad, pad), (0, 0)),
                 constant_values=pad_value)
    cols = []
    for ky in range(kh):
        for kx in range(kw):
            cols.append(xp[:, ky:ky + stride * Ho:stride,
                           kx:kx + stride * Wo:stride, :])
    return jnp.concatenate(cols, axis=-1), Ho, Wo


def conv_bn_act(x, layer, stride, pad, relu, residual=None):
    """Conv (im2col matmul) + folded eval-mode BN + optional fused residual/ReLU."""
    N, H, W, C = x.shape
    kh, kw = layer['kh'], layer['kw']
    patches, Ho, Wo = extract_patches(x, kh, kw, stride, pad)
    a = patches.reshape(N * Ho * Wo, kh * kw * C)
    res2d = None
    if residual is not None:
        res2d = residual.reshape(N * Ho * Wo, -1)
    out = matmul_scale_shift(a, layer['w_mat'], layer['scale'], layer['shift'],
                             relu=relu, residual=res2d, out_dtype=jnp.bfloat16)
    return out.reshape(N, Ho, Wo, layer['w_mat'].shape[1])


def maxpool_3x3_s2_p1(x):
    N, H, W, C = x.shape
    neg = float(jnp.finfo(x.dtype).min)
    patches, Ho, Wo = extract_patches(x, 3, 3, 2, 1, pad_value=neg)
    p = patches.reshape(N * Ho * Wo, 9, C)
    return max_over_axis1(p).reshape(N, Ho, Wo, C)


def bottleneck_forward(x, p):
    stride = p['stride']
    if 'down' in p:
        identity = conv_bn_act(x, p['down'], stride, 0, relu=False)
    else:
        identity = x
    out = conv_bn_act(x, p['cb1'], 1, 0, relu=True)
    out = conv_bn_act(out, p['cb2'], stride, 1, relu=True)
    # conv3 + BN + residual add + ReLU fused into one matmul epilogue
    out = conv_bn_act(out, p['cb3'], 1, 0, relu=True, residual=identity)
    return out


def resnet50_forward(x_nchw, params):
    """ResNet-50 backbone (6-channel conv1, fc=Identity). [N,6,H,W] -> [N,2048]."""
    x = jnp.transpose(x_nchw, (0, 2, 3, 1)).astype(jnp.bfloat16)  # NHWC, bf16 activations
    x = conv_bn_act(x, params['stem'], 2, 3, relu=True)
    x = maxpool_3x3_s2_p1(x)
    for blks in params['layers']:
        for p in blks:
            x = bottleneck_forward(x, p)
    N, H, W, C = x.shape
    return mean_over_axis1(x.reshape(N, H * W, C))  # adaptive avg pool -> [N, 2048]


def fc_forward(x, p):
    ones = jnp.ones((p['W_T'].shape[1],), jnp.float32)
    return matmul_scale_shift(x, p['W_T'], ones, p['b'], relu=False,
                              out_dtype=jnp.float32)


def stack_frames(frames, reverse=False):
    T = frames.shape[0]
    if reverse:
        return jnp.concatenate([frames[1:T], frames[0:T - 1]], axis=2)
    return jnp.concatenate([frames[0:T - 1], frames[1:T]], axis=2)


def stackcl_forward(frames, params):
    """frames: [T, B, 3, H, W] -> logits [T-1, B, classes]."""
    frames = stack_frames(frames)                     # [T-1, B, 6, H, W]
    T1, B = frames.shape[0], frames.shape[1]
    x = frames.reshape((T1 * B,) + frames.shape[2:])  # time_distributed(backbone)
    feats = resnet50_forward(x, params['backbone'])   # [T1*B, 2048]
    feats = feats.reshape(T1, B, -1)
    feats = lstm_forward(feats, params['lstm'])       # [T1, B, lstm_units]
    logits = fc_forward(feats.reshape(T1 * B, -1), params['fc'])  # time_distributed(fc)
    return logits.reshape(T1, B, -1)


# --------------------------- parameter init ---------------------------------

class KeyGen:
    def __init__(self, seed):
        self._key = jax.random.PRNGKey(seed)

    def __call__(self):
        self._key, sub = jax.random.split(self._key)
        return sub


def init_conv_bn(kg, cout, cin, kh, kw):
    """Conv weight in im2col layout (bf16) + eval-mode BN folded to f32 scale/shift."""
    fan_in = cin * kh * kw
    w = jax.random.normal(kg(), (cout, cin, kh, kw), jnp.float32) / math.sqrt(fan_in)
    w_mat = jnp.transpose(w, (2, 3, 1, 0)).reshape(kh * kw * cin, cout)
    gamma = jnp.ones((cout,), jnp.float32)
    beta = jnp.zeros((cout,), jnp.float32)
    mean = jnp.zeros((cout,), jnp.float32)
    var = jnp.ones((cout,), jnp.float32)
    scale = gamma / jnp.sqrt(var + EPS)
    shift = beta - mean * scale
    return {'w_mat': w_mat.astype(jnp.bfloat16), 'kh': kh, 'kw': kw,
            'scale': scale, 'shift': shift}


def init_bottleneck(kg, cin, planes, stride):
    p = {'cb1': init_conv_bn(kg, planes, cin, 1, 1),
         'cb2': init_conv_bn(kg, planes, planes, 3, 3),
         'cb3': init_conv_bn(kg, planes * 4, planes, 1, 1),
         'stride': stride}
    if stride != 1 or cin != planes * 4:
        p['down'] = init_conv_bn(kg, planes * 4, cin, 1, 1)
    return p


def init_resnet50(kg):
    params = {'stem': init_conv_bn(kg, 64, 6, 7, 7)}
    layers_cfg = [(64, 3, 1), (128, 4, 2), (256, 6, 2), (512, 3, 2)]
    cin, layers = 64, []
    for planes, blocks, stride in layers_cfg:
        blks = []
        for b in range(blocks):
            s = stride if b == 0 else 1
            blks.append(init_bottleneck(kg, cin, planes, s))
            cin = planes * 4
        layers.append(blks)
    params['layers'] = layers
    return params


def _pad_gate_cols(m, H, Hp):
    """[..., 4H] -> [..., 4Hp] with per-gate (i,f,g,o) zero padding."""
    pad = [(0, 0)] * (m.ndim - 1) + [(0, Hp - H)]
    return jnp.concatenate(
        [jnp.pad(m[..., g * H:(g + 1) * H], pad) for g in range(4)], axis=-1)


def init_stackcl(classes, lstm_units, seed=42):
    kg = KeyGen(seed)
    backbone = init_resnet50(kg)
    in_planes = 2048
    H = lstm_units
    Hp = _round_up(H, 128)
    k = 1.0 / math.sqrt(H)
    W_ih = jax.random.uniform(kg(), (4 * H, in_planes), jnp.float32, -k, k)
    W_hh = jax.random.uniform(kg(), (4 * H, H), jnp.float32, -k, k)
    b_ih = jax.random.uniform(kg(), (4 * H,), jnp.float32, -k, k)
    b_hh = jax.random.uniform(kg(), (4 * H,), jnp.float32, -k, k)
    # Pre-fold: transposed & gate-padded so the padded hidden units stay exactly zero.
    lstm = {
        'hidden': H,
        'hidden_pad': Hp,
        'W_ih_T': _pad_gate_cols(W_ih.T, H, Hp).astype(jnp.bfloat16),      # [D, 4Hp]
        'W_hh_T': jnp.pad(_pad_gate_cols(W_hh.T, H, Hp),
                          ((0, Hp - H), (0, 0))).astype(jnp.float32),      # [Hp, 4Hp]
        'b': _pad_gate_cols((b_ih + b_hh)[None, :], H, Hp)[0],             # [4Hp]
    }
    kf = 1.0 / math.sqrt(H)
    W_fc = jax.random.uniform(kg(), (classes, H), jnp.float32, -kf, kf)
    b_fc = jax.random.uniform(kg(), (classes,), jnp.float32, -kf, kf)
    fc = {'W_T': W_fc.T.astype(jnp.bfloat16), 'b': b_fc}
    return {'backbone': backbone, 'lstm': lstm, 'fc': fc}


# --------------------------------- main --------------------------------------

if __name__ == "__main__":
    T, B, C, H, W = 8, 2, 3, 16, 16
    classes, lstm_units = 5, 32

    params = init_stackcl(classes, lstm_units, seed=42)
    frames = jax.random.normal(jax.random.PRNGKey(0), (T, B, C, H, W), jnp.float32)

    out = stackcl_forward(frames, params)
    out = jax.block_until_ready(out)

    assert out.shape == (T - 1, B, classes), out.shape
    assert bool(jnp.all(jnp.isfinite(out)))
    print("KERNEL_OK")
</pallas_src>

<mosaic_0001>
module attributes {stable_mosaic.version = 11 : i64} {
  func.func @_mm_kernel(%arg0: i32, %arg1: i32, %arg2: i32, %arg3: memref<256x256xbf16, #tpu.memory_space<vmem>>, %arg4: memref<256x128xbf16, #tpu.memory_space<vmem>>, %arg5: memref<1x128xf32, #tpu.memory_space<vmem>>, %arg6: memref<1x128xf32, #tpu.memory_space<vmem>>, %arg7: memref<256x128xbf16, #tpu.memory_space<vmem>>, %arg8: memref<256x128xf32, #tpu.memory_space<vmem>>) attributes {dimension_semantics = [#tpu.dimension_semantics<parallel>, #tpu.dimension_semantics<parallel>, #tpu.dimension_semantics<arbitrary>], iteration_bounds = array<i64: 4, 1, 2>, scalar_prefetch = 0 : i64, scratch_operands = 1 : i64, tpu.core_type = #tpu.core_type<tc>, window_params = [{transform_indices = @transform_0, window_bounds = array<i64: 256, 256>}, {transform_indices = @transform_1, window_bounds = array<i64: 256, 128>}, {transform_indices = @transform_2, window_bounds = array<i64: 1, 128>}, {transform_indices = @transform_3, window_bounds = array<i64: 1, 128>}, {transform_indices = @transform_4, window_bounds = array<i64: 256, 128>}]} {
    %c0_i32 = arith.constant 0 : i32
    %0 = arith.cmpi eq, %arg2, %c0_i32 : i32
    %1 = arith.extui %0 : i1 to i32
    %c0_i32_0 = arith.constant 0 : i32
    %2 = arith.cmpi ne, %1, %c0_i32_0 : i32
    scf.if %2 {
      %cst_9 = arith.constant 0.000000e+00 : f32
      %12 = vector.broadcast %cst_9 : f32 to vector<256x128xf32>
      %c0_10 = arith.constant 0 : index
      %c0_11 = arith.constant 0 : index
      %13 = vector.load %arg8[%c0_10, %c0_11] : memref<256x128xf32, #tpu.memory_space<vmem>>, vector<256x128xf32>
      tpu.vector_store %arg8[%c0_10, %c0_11], %12 {strides = array<i32>} : memref<256x128xf32, #tpu.memory_space<vmem>>, vector<256x128xf32>,
    } else {
    }
    %c0 = arith.constant 0 : index
    %c0_1 = arith.constant 0 : index
    %3 = vector.load %arg8[%c0, %c0_1] : memref<256x128xf32, #tpu.memory_space<vmem>>, vector<256x128xf32>
    %c0_2 = arith.constant 0 : index
    %c0_3 = arith.constant 0 : index
    %4 = vector.load %arg3[%c0_2, %c0_3] : memref<256x256xbf16, #tpu.memory_space<vmem>>, vector<256x256xbf16>
    %c0_4 = arith.constant 0 : index
    %c0_5 = arith.constant 0 : index
    %5 = vector.load %arg4[%c0_4, %c0_5] : memref<256x128xbf16, #tpu.memory_space<vmem>>, vector<256x128xbf16>
    %cst = arith.constant dense<0.000000e+00> : vector<256x128xf32>
    %6 = tpu.matmul %4, %5, %cst {dimension_numbers = #tpu.dot_dimension_numbers<[1], [0], [0], [1], [0, 0, 1, 1], [], []>} : vector<256x256xbf16>, vector<256x128xbf16>, vector<256x128xf32> -> vector<256x128xf32>
    %7 = arith.addf %3, %6 : vector<256x128xf32>
    %c0_6 = arith.constant 0 : index
    %c0_7 = arith.constant 0 : index
    %8 = vector.load %arg8[%c0_6, %c0_7] : memref<256x128xf32, #tpu.memory_space<vmem>>, vector<256x128xf32>
    tpu.vector_store %arg8[%c0_6, %c0_7], %7 {strides = array<i32>} : memref<256x128xf32, #tpu.memory_space<vmem>>, vector<256x128xf32>,
    %c1_i32 = arith.constant 1 : i32
    %9 = arith.cmpi eq, %arg2, %c1_i32 : i32
    %10 = arith.extui %9 : i1 to i32
    %c0_i32_8 = arith.constant 0 : i32
    %11 = arith.cmpi ne, %10, %c0_i32_8 : i32
    scf.if %11 {
      %c0_9 = arith.constant 0 : index
      %c0_10 = arith.constant 0 : index
      %12 = vector.load %arg8[%c0_9, %c0_10] : memref<256x128xf32, #tpu.memory_space<vmem>>, vector<256x128xf32>
      %c0_11 = arith.constant 0 : index
      %c0_12 = arith.constant 0 : index
      %13 = vector.load %arg5[%c0_11, %c0_12] : memref<1x128xf32, #tpu.memory_space<vmem>>, vector<1x128xf32>
      %14 = vector.broadcast %13 : vector<1x128xf32> to vector<256x128xf32>
      %15 = arith.mulf %12, %14 : vector<256x128xf32>
      %c0_13 = arith.constant 0 : index
      %c0_14 = arith.constant 0 : index
      %16 = vector.load %arg6[%c0_13, %c0_14] : memref<1x128xf32, #tpu.memory_space<vmem>>, vector<1x128xf32>
      %17 = vector.broadcast %16 : vector<1x128xf32> to vector<256x128xf32>
      %18 = arith.addf %15, %17 : vector<256x128xf32>
      %cst_15 = arith.constant 0.000000e+00 : f32
      %19 = vector.broadcast %cst_15 : f32 to vector<256x128xf32>
      %20 = arith.maximumf %18, %19 : vector<256x128xf32>
      %21 = arith.truncf %20 : vector<256x128xf32> to vector<256x128xbf16>
      %c0_16 = arith.constant 0 : index
      %c0_17 = arith.constant 0 : index
      %22 = vector.load %arg7[%c0_16, %c0_17] : memref<256x128xbf16, #tpu.memory_space<vmem>>, vector<256x128xbf16>
      tpu.vector_store %arg7[%c0_16, %c0_17], %21 {strides = array<i32>} : memref<256x128xbf16, #tpu.memory_space<vmem>>, vector<256x128xbf16>,
    } else {
    }
    return
  }
  func.func @transform_0(%arg0: i32, %arg1: i32, %arg2: i32) -> (i32, i32) {
    %c0_i32 = arith.constant 0 : i32
    return %arg0, %arg2 : i32, i32
  }
  func.func @transform_1(%arg0: i32, %arg1: i32, %arg2: i32) -> (i32, i32) {
    %c0_i32 = arith.constant 0 : i32
    return %arg2, %arg1 : i32, i32
  }
  func.func @transform_2(%arg0: i32, %arg1: i32, %arg2: i32) -> (i32, i32) {
    %c0_i32 = arith.constant 0 : i32
    %c0_i32_0 = arith.constant 0 : i32
    return %c0_i32, %arg1 : i32, i32
  }
  func.func @transform_3(%arg0: i32, %arg1: i32, %arg2: i32) -> (i32, i32) {
    %c0_i32 = arith.constant 0 : i32
    %c0_i32_0 = arith.constant 0 : i32
    return %c0_i32, %arg1 : i32, i32
  }
  func.func @transform_4(%arg0: i32, %arg1: i32, %arg2: i32) -> (i32, i32) {
    %c0_i32 = arith.constant 0 : i32
    return %arg0, %arg1 : i32, i32
  }
}

</mosaic_0001>

<bundles_post_ra>
// kernel: tpu_custom_call.1
= control target key start
LH: loop header
LB: loop body
LE: loop exit
PB: predicated region body
PF: predicated region fallthrough
CT: control target
= control target key end

     0   :  { %s2637_s0 = inlined_call_operand.hbm [shape: bf16[1024,512], index: 0, kind: input, shape index: {}]   ;;  %s2638_s1 = inlined_call_operand.hbm [shape: bf16[512,128], index: 1, kind: input, shape index: {}]   ;;  %s2639_s2 = inlined_call_operand.vmem [shape: f32[1,128], index: 2, kind: input, shape index: {}]   ;;  %s2640_s3 = inlined_call_operand.vmem [shape: f32[1,128], index: 3, kind: input, shape index: {}]   ;;  %s2641_s4 = inlined_call_operand.hbm [shape: bf16[1024,128], index: 4, kind: output, shape index: {}]  }
   0x1   :  { %2647 = sst [smem:[#allocation17_spill]] %s2637_s0 }
   0x2   :  { %2648 = sst [smem:[#allocation18_spill]] %s2639_s2 }
   0x3   :  { %2649 = sst [smem:[#allocation19_spill]] %s2640_s3 }
   0x4   :  { %2650 = sst [smem:[#allocation20_spill]] %s2641_s4 }
   0x5   :  { %9 = vsyncpa [#allocation4], 0 }
   0x6   :  { %11 = vsyncpa [#allocation4 + $0x1], 0 }
   0x7   :  { %12 = vsyncpa [#allocation7], 0 }
   0x8   :  { %14 = vsyncpa [#allocation7 + $0x1], 0 }
   0x9   :  { %15 = vsyncpa [#allocation5], 0 }
   0xa   :  { %17 = vsyncpa [#allocation5 + $0x1], 0  ;;  %s2203_s15 = smov 0   ;;  %s2205_s16 = smov 0  }
   0xb   :  { %s2207_s17 = smov 0   ;;  %s2209_s18 = smov 0  }
   0xc   :  { %s2211_s19 = smov 0   ;;  %s2213_s20 = smov 0  }
   0xd   :  { %s2215_s21 = smov 0   ;;  %s2217_s22 = smov 0  }
   0xe   :  { %s2219_s23 = smov 0   ;;  %s2221_s24 = smov 0  }
   0xf   :  { %s2223_s25 = smov 0   ;;  %s2225_s26 = smov 0  }
  0x10   :  { %s2227_s27 = smov 0   ;;  %s2229_s28 = smov 0  }
  0x11 LB: > { %2651 = sst [smem:[#allocation12_spill]] %s2149_s24  ;;  %s35_s29 = sadd.s32 1, %s2157_s26  ;;  %s2165_s28 = sphi %s2229_s28, %s23_s28   ;;  %s2161_s27 = sphi %s2227_s27, %s2677_s27   ;;  %s2157_s26 = sphi %s2225_s26, %s2688_s26   ;;  %s2153_s25 = sphi %s2223_s25, %s2675_s25   ;;  %s2149_s24 = sphi %s2221_s24, %s2687_s24   ;;  %s2145_s23 = sphi %s2219_s23, %s2686_s23   ;;  %s2141_s22 = sphi %s2217_s22, %s2685_s22   ;;  %s2137_s21 = sphi %s2215_s21, %s2684_s21   ;;  %s2133_s20 = sphi %s2213_s20, %s2683_s20   ;;  %s2129_s19 = sphi %s2211_s19, %s2682_s19   ;;  %s2125_s18 = sphi %s2209_s18, %s2681_s18   ;;  %s2121_s17 = sphi %s2207_s17, %s2680_s17   ;;  %s2117_s16 = sphi %s2205_s16, %s2679_s16   ;;  %s2113_s15 = sphi %s2203_s15, %s2678_s15  }
  0x12   : > { %2652 = sst [smem:[#allocation13_spill]] %s2153_s25  ;;  %s42_s30 = sadd.s32 1, %s2161_s27 }
  0x13   : > { %2653 = sst [smem:[#allocation14_spill]] %s2161_s27  ;;  %p36_p0 = scmp.ge.s32.totalorder %s35_s29, 2 }
  0x14   : > { %s51_s5 = sadd.s32 1, %s2145_s23  ;;  %p58_p1 = scmp.ne.s32.totalorder %s2145_s23, %s2141_s22 }
  0x15   : > { %p59_p2 = scmp.eq.s32.totalorder %s2165_s28, 0  ;;  %s2690_s29 = smov (%p36_p0, %s35_s29), 0 }
  0x16   : > { %2654 = sst [smem:[#allocation15_spill]] %s2690_s29  ;;  %s2692_s30 = smov (!%p36_p0, %s42_s30), %s2161_s27 }
  0x17   : > { %s2284_s6 = ssub.s32 %s2157_s26, %s2690_s29  ;;  %p2288_p3 = por %p59_p2, %p58_p1 }
  0x18   : > { %p44_p4 = scmp.ge.s32.totalorder %s2692_s30, 4  ;;  %p64_p5 = scmp.ne.s32.totalorder %s2141_s22, %s2137_s21 }
  0x19   : > { %s159_s8 = sadd.s32 1, %s2121_s17  ;;  %p2645_p6 = scmp.lt.s32.totalorder %s2165_s28, 8 }
  0x1a   : > { %s2694_s30 = smov (%p44_p4, %s2692_s30), 0  ;;  %s208_s9 = sand.u32 1, %s2145_s23  }
  0x1b   : > { %2656 = sst [smem:[#allocation16_spill]] %s2694_s30  ;;  %s46_s10 = ssub.s32 %s2161_s27, %s2694_s30 }
  0x1c   : > { %s48_s11 = sor.u32 %s2284_s6, %s46_s10  ;;  %p157_p7 = scmp.eq.s32.totalorder %s46_s10, 0 }
  0x1d   : > { %p49_p8 = scmp.eq.s32.totalorder %s48_s11, 0  ;;  %s1399_s12 = sshll.u32 %s208_s9, 8 }
  0x1e   : > { %s2303_s13 = scalar_select %p157_p7, %s2121_s17, %s159_s8  }
  0x1f   : > { %s2306_s14 = scalar_select %p49_p8, %s2145_s23, %s51_s5  }
  0x20   : > { %s1401_s29 = sshll.u32 %s2157_s26, 1  ;;  %s1500_s4 = sshll.u32 %s2161_s27, 7 }
  0x21   : > { %s212_s25 = scalar_lea.vmem [#allocation3], %s1399_s12  ;;  %s219_s2 = sadd.s32 %s1500_s4, %s1401_s29 }
  0x22   : > { %s222_s3 = sshll.u32 %s212_s25, 4  ;;  %s1403_s24 = sshll.u32 %s219_s2, 6  ;;  %s223_s3 = int_to_ptr.vmem [resolvable:$true] %s222_s3 }
  0x23   : > { %p2314_p9 = pnand %p2645_p6, %p2288_p3  ;;  %s2658_s0 = sld [smem:[#allocation17_spill]] }
  0x24   : > { %p1407_p10 = scmp.ge.s32.totalorder %s2165_s28, 1  ;;  %s209_s5 = scalar_lea.sflag [#allocation4], %s208_s9 }
  0x25   : > { %p1963_p11 = pneg %p2314_p9  ;;  %s1974_s12 = scalar_lea.vmem %s223_s3, 4096 }
  0x26   : > { %p1975_p12 = scmp.ne.s32.totalorder %s223_s3, %s1974_s12  ;;  %s2167_s2 = smov [#allocation3]  }
  0x27   : > { %s1979_s4 = sshll.u32 %s2167_s2, 4  ;;  %s1980_s4 = int_to_ptr.vmem [resolvable:$false] %s1979_s4 }
  0x28   : > { %p1977_p13 = pnand %p1975_p12, %p1963_p11  ;;  %s1981_s25 = scalar_lea.vmem %s1980_s4, 8192 }
  0x29   : > { %s221_s8 = scalar_lea.hbm %s2658_s0, %s1403_s24  ;;  %p1982_p1 = scmp.lt.s32.totalorder %s223_s3, %s1980_s4 }
  0x2a   : > { %p1978_p0 = pneg %p1977_p13  ;;  %p1983_p3 = scmp.lt.s32.totalorder %s1981_s25, %s1974_s12 }
  0x2c   : > { %p1984_p4 = por %p1983_p3, %p1982_p1 }
  0x2e   : > { %p1985_p7 = pnand %p1984_p4, %p1978_p0 }
  0x30   : > { %1988 = shalt.err (!%p1985_p7)
}
  0x31   : > { %s2168_s29 = smov 256   ;;  %s2169_s24 = smov 128  }
  0x32   : > { %s2170_s7 = smov 8   ;;  %p252_p8 = scmp.lt.s32.totalorder %s2165_s28, 9 }
  0x33   : > { %1767 = dma.hbm_to_vmem [thread:$0]  (!%p2314_p9), %s221_s8, 4096, %s223_s3, %s209_s5, %s2168_s29, %s2169_s24, %s2170_s7  }
  0x34   : > { %p2329_p11 = pnand %p1407_p10, %p252_p8  ;;  %s1393_s10 = sadd.s32 4294967295, %s2165_s28  }
  0x35   : > { %s1394_s11 = sadd.s32 4294967294, %s2165_s28   ;;  %p65_p12 = scmp.eq.s32.totalorder %s1393_s10, 0 }
  0x36   : > { %p77_p13 = scmp.eq.s32.totalorder %s2284_s6, 0  ;;  %s79_s12 = sadd.s32 1, %s2133_s20 }
  0x37   : > { %p86_p0 = scmp.ne.s32.totalorder %s2133_s20, %s2129_s19  ;;  %p2342_p1 = por %p65_p12, %p64_p5 }
  0x38   : > { %p92_p9 = scmp.ne.s32.totalorder %s2129_s19, %s2125_s18  ;;  %p169_p4 = scmp.ne.s32.totalorder %s2121_s17, %s2117_s16 }
  0x39   : > { %s2349_s3 = scalar_select %p77_p13, %s2133_s20, %s79_s12  }
  0x3a   : > { %p2353_p10 = por %p86_p0, %p59_p2  ;;  %p2357_p3 = por %p92_p9, %p65_p12 }
  0x3b   : > { %p170_p7 = scmp.eq.s32.totalorder %s1393_s10, 7  ;;  %p175_p5 = scmp.ne.s32.totalorder %s2117_s16, %s2113_s15 }
  0x3c   : > { %p176_p8 = scmp.eq.s32.totalorder %s1394_s11, 7  ;;  %s232_s18 = sand.u32 1, %s2133_s20  }
  0x3d   : > { %p2365_p6 = por %p170_p7, %p169_p4  ;;  %s1404_s2 = sshll.u32 %s232_s18, 7 }
  0x3e   : > { %p2370_p13 = por %p176_p8, %p175_p5  ;;  %s1501_s4 = sshll.u32 %s2157_s26, 11 }
  0x3f   : > { %s243_s24 = scalar_lea.hbm %s2638_s1, %s1501_s4  ;;  %s236_s7 = scalar_lea.vmem [#allocation6], %s1404_s2 }
  0x40   : > { %s2664_s5 = scalar_select %p2370_p13, 1, 0 }
  0x41   : > { %s244_s12 = sshll.u32 %s236_s7, 4  ;;  %p2665_p2 = scmp.lt.s32.totalorder %s2165_s28, 8  ;;  %s245_s12 = int_to_ptr.vmem [resolvable:$true] %s244_s12 }
  0x42   : > { %s233_s11 = scalar_lea.sflag [#allocation7], %s232_s18  ;;  %s2002_s0 = scalar_lea.vmem %s245_s12, 2048 }
  0x43   : > { %p2382_p12 = pnand %p2665_p2, %p2353_p10  ;;  %p2003_p9 = scmp.ne.s32.totalorder %s245_s12, %s2002_s0 }
  0x44   : > { %s2171_s27 = smov [#allocation6]  }
  0x45   : > { %p1991_p0 = pneg %p2382_p12  ;;  %s2007_s25 = sshll.u32 %s2171_s27, 4  ;;  %s2008_s25 = int_to_ptr.vmem [resolvable:$false] %s2007_s25 }
  0x46   : > { %s2009_s2 = scalar_lea.vmem %s2008_s25, 4096  ;;  %p2010_p5 = scmp.lt.s32.totalorder %s245_s12, %s2008_s25 }
  0x47   : > { %p2005_p4 = pnand %p2003_p9, %p1991_p0  ;;  %p2011_p8 = scmp.lt.s32.totalorder %s2009_s2, %s2002_s0 }
  0x49   : > { %p2006_p7 = pneg %p2005_p4  ;;  %p2012_p13 = por %p2011_p8, %p2010_p5 }
  0x4b   : > { %p2013_p10 = pnand %p2012_p13, %p2006_p7 }
  0x4d   : > { %2016 = shalt.err (!%p2013_p10)
}
  0x4e   : > { %s2172_s8 = smov 64   ;;  %s2173_s4 = smov 4  }
  0x4f   : > { %1770 = dma.hbm_to_vmem [thread:$0]  (!%p2382_p12), %s243_s24, 2048, %s245_s12, %s233_s11, %s2172_s8, %s2172_s8, %s2173_s4  }
  0x50   : > { %256 = sbr.rel (%p2329_p11) target bundleno = 474 (0x1da), region = 36  ;;  %s258_s18 = sand.u32 (!%p2329_p11), 1, %s2141_s22  }
  0x51   : > { %s1408_s29 = sshll.u32 (!%p2329_p11), %s258_s18, 8  ;;  %s259_s27 = scalar_lea.sflag (!%p2329_p11), [#allocation4], %s258_s18 }
  0x52   : > { %s2393_s7 = scalar_lea.vmem (!%p2329_p11), [#allocation3], %s1408_s29 }
  0x55   : > { %2100 = dma.done.wait (%p2342_p1), %s259_s27, 4096  }
  0x56   : > { %2102 = vsyncadd (%p2342_p1), %s259_s27, 4294963200  ;;  %s267_s0 = sand.u32 1, %s2129_s19  }
  0x57   : > { %s1409_s10 = sshll.u32 %s267_s0, 7  ;;  %s268_s24 = scalar_lea.sflag [#allocation7], %s267_s0 }
  0x58   : > { %s2400_s12 = scalar_lea.vmem [#allocation6], %s1409_s10 }
  0x59   : > { %2104 = dma.done.wait (%p2357_p3), %s268_s24, 2048  }
  0x5a   : > { %2106 = vsyncadd (%p2357_p3), %s268_s24, 4294965248  ;;  %s304_s9 = sand.u32 1, %s2117_s16   ;;  %s2667_s30 = sld [smem:[#allocation12_spill]] }
  0x5b   : > { %s1410_s11 = sshll.u32 %s304_s9, 7 }
  0x5c   : > { %s2409_s25 = scalar_lea.vmem [#allocation8], %s1410_s11 }
  0x60   : > { %p1411_p11 = scmp.ne.s32.totalorder %s2667_s30, 0 }
  0x62   : > { %321 = sbr.rel (%p1411_p11) target bundleno = 120 (0x78), region = 48 }
  0x67   : > { %v2174_v0 = vmov 0.0  }
  0x68   : > { %322 = vst [vmem:[#allocation2 + $0xb0] sm:$0xff] %v2174_v0  ;;  %323 = vst [vmem:[#allocation2] sm:$0xff] %v2174_v0 }
  0x69   : > { %324 = vst [vmem:[#allocation2 + $0xd8] sm:$0xff] %v2174_v0  ;;  %325 = vst [vmem:[#allocation2 + $0x18] sm:$0xff] %v2174_v0 }
  0x6a   : > { %326 = vst [vmem:[#allocation2 + $0x50] sm:$0xff] %v2174_v0  ;;  %327 = vst [vmem:[#allocation2 + $0x68] sm:$0xff] %v2174_v0 }
  0x6b   : > { %328 = vst [vmem:[#allocation2 + $0x30] sm:$0xff] %v2174_v0  ;;  %329 = vst [vmem:[#allocation2 + $0x48] sm:$0xff] %v2174_v0 }
  0x6c   : > { %330 = vst [vmem:[#allocation2 + $0x80] sm:$0xff] %v2174_v0  ;;  %331 = vst [vmem:[#allocation2 + $0x88] sm:$0xff] %v2174_v0 }
  0x6d   : > { %332 = vst [vmem:[#allocation2 + $0xe8] sm:$0xff] %v2174_v0  ;;  %333 = vst [vmem:[#allocation2 + $0xb8] sm:$0xff] %v2174_v0 }
  0x6e   : > { %334 = vst [vmem:[#allocation2 + $0x60] sm:$0xff] %v2174_v0  ;;  %335 = vst [vmem:[#allocation2 + $0xf0] sm:$0xff] %v2174_v0 }
  0x6f   : > { %336 = vst [vmem:[#allocation2 + $0x8] sm:$0xff] %v2174_v0  ;;  %337 = vst [vmem:[#allocation2 + $0x78] sm:$0xff] %v2174_v0 }
  0x70   : > { %338 = vst [vmem:[#allocation2 + $0x38] sm:$0xff] %v2174_v0  ;;  %339 = vst [vmem:[#allocation2 + $0x58] sm:$0xff] %v2174_v0 }
  0x71   : > { %340 = vst [vmem:[#allocation2 + $0x40] sm:$0xff] %v2174_v0  ;;  %341 = vst [vmem:[#allocation2 + $0xc8] sm:$0xff] %v2174_v0 }
  0x72   : > { %342 = vst [vmem:[#allocation2 + $0xe0] sm:$0xff] %v2174_v0  ;;  %343 = vst [vmem:[#allocation2 + $0x90] sm:$0xff] %v2174_v0 }
  0x73   : > { %344 = vst [vmem:[#allocation2 + $0x70] sm:$0xff] %v2174_v0  ;;  %345 = vst [vmem:[#allocation2 + $0xc0] sm:$0xff] %v2174_v0 }
  0x74   : > { %346 = vst [vmem:[#allocation2 + $0xa8] sm:$0xff] %v2174_v0  ;;  %347 = vst [vmem:[#allocation2 + $0xd0] sm:$0xff] %v2174_v0 }
  0x75   : > { %348 = vst [vmem:[#allocation2 + $0x10] sm:$0xff] %v2174_v0  ;;  %349 = vst [vmem:[#allocation2 + $0x28] sm:$0xff] %v2174_v0 }
  0x76   : > { %350 = vst [vmem:[#allocation2 + $0xa0] sm:$0xff] %v2174_v0  ;;  %351 = vst [vmem:[#allocation2 + $0xf8] sm:$0xff] %v2174_v0 }
  0x77   : > { %352 = vst [vmem:[#allocation2 + $0x20] sm:$0xff] %v2174_v0  ;;  %353 = vst [vmem:[#allocation2 + $0x98] sm:$0xff] %v2174_v0 }
  0x78 PF: > { %v1897_v1 = vld [vmem:[%s2400_s12 + $0x78] sm:$0xff]   ;;  %v1899_v3 = vld [vmem:[%s2400_s12 + $0x70] sm:$0xff]   ;;  %v1901_v5 = vld [vmem:[%s2400_s12 + $0x68] sm:$0xff]   ;;  %s2668_s6 = sld [smem:[#allocation12_spill]] }
  0x79   : > { %v1898_v2 = vld [vmem:[%s2400_s12 + $0x38] sm:$0xff]   ;;  %1630 = vmatprep.subr.bf16.mxu0 %v1897_v1  ;;  %1742 = vmatprep.subr.bf16.mxu1 %v1897_v1  ;;  %v1900_v4 = vld [vmem:[%s2400_s12 + $0x30] sm:$0xff]   ;;  %v1902_v6 = vld [vmem:[%s2400_s12 + $0x28] sm:$0xff]  }
  0x7a   : > { %1631 = vmatpush3.bf16.msra.mxu0 %v1898_v2  ;;  %1750 = vmatpush3.bf16.msra.mxu1 %v1898_v2  ;;  %v1903_v7 = vld [vmem:[%s2400_s12 + $0x60] sm:$0xff]   ;;  %v1905_v9 = vld [vmem:[%s2400_s12 + $0x58] sm:$0xff]   ;;  %v1907_v11 = vld [vmem:[%s2400_s12 + $0x50] sm:$0xff]  }
  0x7b   : > { %1632 = vmatprep.subr.bf16.mxu0 %v1899_v3  ;;  %1743 = vmatprep.subr.bf16.mxu1 %v1899_v3  ;;  %v1904_v8 = vld [vmem:[%s2400_s12 + $0x20] sm:$0xff]   ;;  %v1906_v10 = vld [vmem:[%s2400_s12 + $0x18] sm:$0xff]   ;;  %v1908_v14 = vld [vmem:[%s2400_s12 + $0x10] sm:$0xff]  }
  0x7c   : > { %v1915_v12 = vld [vmem:[%s2393_s7 + $0x4] ss:$8 sps:$4 sm:$0xff]   ;;  %v1913_v19 = vld [vmem:[%s2393_s7] ss:$8 sps:$4 sm:$0xff]   ;;  %v1919_v21 = vld [vmem:[%s2393_s7 + $0x14] ss:$8 sps:$4 sm:$0xff]  }
  0x7d   : > { %v1918_v13 = vld [vmem:[%s2393_s7 + $0x84] ss:$8 sps:$4 sm:$0xff]   ;;  %738 = vmatprep.mubr.bf16.mxu0 %v1915_v12  ;;  %v1916_v20 = vld [vmem:[%s2393_s7 + $0x80] ss:$8 sps:$4 sm:$0xff]   ;;  %v1921_v22 = vld [vmem:[%s2393_s7 + $0x94] ss:$8 sps:$4 sm:$0xff]  }
  0x7e   : > { %1633 = vmatpush3.bf16.msra.mxu0 %v1900_v4  ;;  %1751 = vmatpush3.bf16.msra.mxu1 %v1900_v4  ;;  %v1909_v15 = vld [vmem:[%s2400_s12 + $0x48] sm:$0xff]   ;;  %v1911_v17 = vld [vmem:[%s2400_s12 + $0x40] sm:$0xff]   ;;  %v1923_v23 = vld [vmem:[%s2393_s7 + $0x10] ss:$8 sps:$4 sm:$0xff]   ;;  %p1460_p1 = scmp.ne.s32.totalorder %s2668_s6, 1 }
  0x7f   : > { %1634 = vmatprep.subr.bf16.mxu0 %v1901_v5  ;;  %1744 = vmatprep.subr.bf16.mxu1 %v1901_v5  ;;  %v1910_v16 = vld [vmem:[%s2400_s12 + $0x8] sm:$0xff]   ;;  %v1912_v18 = vld [vmem:[%s2400_s12] sm:$0xff]   ;;  %v1924_v24 = vld [vmem:[%s2393_s7 + $0x90] ss:$8 sps:$4 sm:$0xff]   ;;  %s2669_s4 = sld [smem:[#allocation18_spill]] (!%p1460_p1) }
  0x80   : > { %802 = vmatprep.mubr.bf16.mxu1 %v1918_v13  ;;  %v1925_v25 = vld [vmem:[%s2393_s7 + $0x24] ss:$8 sps:$4 sm:$0xff]   ;;  %v1929_v27 = vld [vmem:[%s2393_s7 + $0x20] ss:$8 sps:$4 sm:$0xff]   ;;  %v1931_v29 = vld [vmem:[%s2393_s7 + $0x34] ss:$8 sps:$4 sm:$0xff]  }
  0x81   : > { %v1927_v26 = vld [vmem:[%s2393_s7 + $0xa4] ss:$8 sps:$4 sm:$0xff]   ;;  %v1930_v28 = vld [vmem:[%s2393_s7 + $0xa0] ss:$8 sps:$4 sm:$0xff]   ;;  %v1933_v30 = vld [vmem:[%s2393_s7 + $0xb4] ss:$8 sps:$4 sm:$0xff]  }
  0x82   : > { %1635 = vmatpush3.bf16.msra.mxu0 %v1902_v6  ;;  %1752 = vmatpush3.bf16.msra.mxu1 %v1902_v6  ;;  %v1935_v31 = vld [vmem:[%s2393_s7 + $0x30] ss:$8 sps:$4 sm:$0xff]   ;;  %v1937_v33 = vld [vmem:[%s2393_s7 + $0x44] ss:$8 sps:$4 sm:$0xff]   ;;  %v1941_v35 = vld [vmem:[%s2393_s7 + $0x40] ss:$8 sps:$4 sm:$0xff]  }
  0x83   : > { %1636 = vmatprep.subr.bf16.mxu0 %v1903_v7  ;;  %1745 = vmatprep.subr.bf16.mxu1 %v1903_v7  ;;  %v1936_v32 = vld [vmem:[%s2393_s7 + $0xb0] ss:$8 sps:$4 sm:$0xff]   ;;  %v1939_v34 = vld [vmem:[%s2393_s7 + $0xc4] ss:$8 sps:$4 sm:$0xff]   ;;  %v1942_v36 = vld [vmem:[%s2393_s7 + $0xc0] ss:$8 sps:$4 sm:$0xff]  }
  0x84   : > { %v1943_v37 = vld [vmem:[%s2393_s7 + $0x54] ss:$8 sps:$4 sm:$0xff]   ;;  %v1947_v39 = vld [vmem:[%s2393_s7 + $0x50] ss:$8 sps:$4 sm:$0xff]   ;;  %v1949_v41 = vld [vmem:[%s2393_s7 + $0x64] ss:$8 sps:$4 sm:$0xff]  }
  0x85   : > { %v1945_v38 = vld [vmem:[%s2393_s7 + $0xd4] ss:$8 sps:$4 sm:$0xff]   ;;  %v1948_v40 = vld [vmem:[%s2393_s7 + $0xd0] ss:$8 sps:$4 sm:$0xff]   ;;  %v1951_v42 = vld [vmem:[%s2393_s7 + $0xe4] ss:$8 sps:$4 sm:$0xff]  }
  0x86   : > { %1637 = vmatpush3.bf16.msra.mxu0 %v1904_v8  ;;  %1753 = vmatpush3.bf16.msra.mxu1 %v1904_v8  ;;  %v1953_v43 = vld [vmem:[%s2393_s7 + $0x60] ss:$8 sps:$4 sm:$0xff]   ;;  %v1955_v45 = vld [vmem:[%s2393_s7 + $0x74] ss:$8 sps:$4 sm:$0xff]   ;;  %v1959_v47 = vld [vmem:[%s2393_s7 + $0x70] ss:$8 sps:$4 sm:$0xff]  }
  0x87   : > { %1638 = vmatprep.subr.bf16.mxu0 %v1905_v9  ;;  %1746 = vmatprep.subr.bf16.mxu1 %v1905_v9  ;;  %v1954_v44 = vld [vmem:[%s2393_s7 + $0xe0] ss:$8 sps:$4 sm:$0xff]   ;;  %v1957_v46 = vld [vmem:[%s2393_s7 + $0xf4] ss:$8 sps:$4 sm:$0xff]   ;;  %v1960_v48 = vld [vmem:[%s2393_s7 + $0xf0] ss:$8 sps:$4 sm:$0xff]  }
  0x88   : > { %v354_v51 = vld [vmem:[#allocation2 + $0xb0] sm:$0xff]  ;;  %v370_v53 = vld [vmem:[#allocation2 + $0x38] sm:$0xff]  ;;  %v355_v61 = vld [vmem:[#allocation2] sm:$0xff]  ;;  %s2670_s27 = sld [smem:[#allocation19_spill]] (!%p1460_p1) }
  0x89   : > { %v371_v63 = vld [vmem:[#allocation2 + $0x58] sm:$0xff]  ;;  %v372_v9 = vld [vmem:[#allocation2 + $0x40] sm:$0xff] }
  0x8a   : > { %1639 = vmatpush3.bf16.msra.mxu0 %v1906_v10  ;;  %1754 = vmatpush3.bf16.msra.mxu1 %v1906_v10  ;;  %v356_v7 = vld [vmem:[#allocation2 + $0xd8] sm:$0xff] }
  0x8b   : > { %1640 = vmatprep.subr.bf16.mxu0 %v1907_v11  ;;  %1747 = vmatprep.subr.bf16.mxu1 %v1907_v11 }
  0x8e   : > { %1641 = vmatpush3.bf16.msra.mxu0 %v1908_v14  ;;  %1755 = vmatpush3.bf16.msra.mxu1 %v1908_v14 }
  0x8f   : > { %1642 = vmatprep.subr.bf16.mxu0 %v1909_v15  ;;  %1748 = vmatprep.subr.bf16.mxu1 %v1909_v15 }
  0x92   : > { %1643 = vmatpush3.bf16.msra.mxu0 %v1910_v16  ;;  %1756 = vmatpush3.bf16.msra.mxu1 %v1910_v16 }
  0x93   : > { %1644 = vmatprep.subr.bf16.mxu0 %v1911_v17  ;;  %1749 = vmatprep.subr.bf16.mxu1 %v1911_v17  ;;  %v357_v17 = vld [vmem:[#allocation2 + $0x18] sm:$0xff] }
  0x96   : > { %1645 = vmatpush3.bf16.msra.mxu0 %v1912_v18  ;;  %1757 = vmatpush3.bf16.msra.mxu1 %v1912_v18 }
  0x99   : > { %739 = vmatmul.mubr.bf16.vlgmr.msra.gmra.mxu0 %v1913_v19  ;;  %803 = vmatmul.mubr.bf16.vlgmr.msra.gmra.mxu1 %v1916_v20  ;;  %v373_v19 = vld [vmem:[#allocation2 + $0xc8] sm:$0xff] }
  0x9a   : > { %746 = vmatprep.mubr.bf16.mxu0 %v1919_v21  ;;  %810 = vmatprep.mubr.bf16.mxu1 %v1921_v22 }
  0xa1   : > { %747 = vmatmul.mubr.bf16.gmra.mxu0 %v1923_v23  ;;  %811 = vmatmul.mubr.bf16.gmra.mxu1 %v1924_v24 }
  0xa2   : > { %754 = vmatprep.mubr.bf16.mxu0 %v1925_v25  ;;  %818 = vmatprep.mubr.bf16.mxu1 %v1927_v26 }
  0xa9   : > { %755 = vmatmul.mubr.bf16.gmra.mxu0 %v1929_v27  ;;  %819 = vmatmul.mubr.bf16.gmra.mxu1 %v1930_v28  ;;  %v358_v27 = vld [vmem:[#allocation2 + $0x50] sm:$0xff] }
  0xaa   : > { %762 = vmatprep.mubr.bf16.mxu0 %v1931_v29  ;;  %826 = vmatprep.mubr.bf16.mxu1 %v1933_v30  ;;  %v374_v29 = vld [vmem:[#allocation2 + $0xe0] sm:$0xff] }
  0xb1   : > { %763 = vmatmul.mubr.bf16.gmra.mxu0 %v1935_v31  ;;  %827 = vmatmul.mubr.bf16.gmra.mxu1 %v1936_v32 }
  0xb2   : > { %770 = vmatprep.mubr.bf16.mxu0 %v1937_v33  ;;  %834 = vmatprep.mubr.bf16.mxu1 %v1939_v34 }
  0xb9   : > { %771 = vmatmul.mubr.bf16.gmra.mxu0 %v1941_v35  ;;  %835 = vmatmul.mubr.bf16.gmra.mxu1 %v1942_v36 }
  0xba   : > { %778 = vmatprep.mubr.bf16.mxu0 %v1943_v37  ;;  %842 = vmatprep.mubr.bf16.mxu1 %v1945_v38  ;;  %v359_v37 = vld [vmem:[#allocation2 + $0x68] sm:$0xff] }
  0xc1   : > { %779 = vmatmul.mubr.bf16.gmra.mxu0 %v1947_v39  ;;  %843 = vmatmul.mubr.bf16.gmra.mxu1 %v1948_v40  ;;  %v375_v39 = vld [vmem:[#allocation2 + $0x90] sm:$0xff] }
  0xc2   : > { %786 = vmatprep.mubr.bf16.mxu0 %v1949_v41  ;;  %850 = vmatprep.mubr.bf16.mxu1 %v1951_v42 }
  0xc9   : > { %787 = vmatmul.mubr.bf16.gmra.mxu0 %v1953_v43  ;;  %851 = vmatmul.mubr.bf16.gmra.mxu1 %v1954_v44 }
  0xca   : > { %794 = vmatprep.mubr.bf16.mxu0 %v1955_v45  ;;  %858 = vmatprep.mubr.bf16.mxu1 %v1957_v46 }
  0xd1   : > { %795 = vmatmul.mubr.bf16.gmra.mxu0 %v1959_v47  ;;  %859 = vmatmul.mubr.bf16.gmra.mxu1 %v1960_v48  ;;  %v360_v47 = vld [vmem:[#allocation2 + $0x30] sm:$0xff] }
 0x159   : > { %v1646_v49 = vpop.f32.mrf.mxu0  ;;  %v1694_v50 = vpop.f32.mrf.mxu1 }
 0x15b   : > { %v1647_v52 = vpop.f32.mrf.mxu0  ;;  %v1695_v54 = vpop.f32.mrf.mxu1 }
 0x15c   : > { %v1648_v55 = vadd.f32 %v1647_v52, %v1646_v49  ;;  %v1696_v56 = vadd.f32 %v1695_v54, %v1694_v50  ;;  %v376_v49 = vld [vmem:[#allocation2 + $0x70] sm:$0xff] }
 0x15d   : > { %v1649_v57 = vpop.f32.mrf.mxu0  ;;  %v1697_v58 = vpop.f32.mrf.mxu1 }
 0x15e   : > { %v867_v59 = vadd.f32 %v1648_v55, %v354_v51  ;;  %v883_v60 = vadd.f32 %v1696_v56, %v370_v53 }
 0x15f   : > { %v1650_v62 = vpop.f32.mrf.mxu0  ;;  %v1698_v0 = vpop.f32.mrf.mxu1 }
 0x160   : > { %899 = vst [vmem:[#allocation2 + $0xb0] sm:$0xff] %v867_v59  ;;  %915 = vst [vmem:[#allocation2 + $0x38] sm:$0xff] %v883_v60  ;;  %v1651_v1 = vadd.f32 %v1650_v62, %v1649_v57  ;;  %v1699_v2 = vadd.f32 %v1698_v0, %v1697_v58  ;;  %v361_v57 = vld [vmem:[#allocation2 + $0x48] sm:$0xff]  ;;  %v377_v59 = vld [vmem:[#allocation2 + $0xc0] sm:$0xff] }
 0x161   : > { %v1652_v3 = vpop.f32.mrf.mxu0  ;;  %v1700_v4 = vpop.f32.mrf.mxu1 }
 0x162   : > { %v868_v5 = vadd.f32 %v1651_v1, %v355_v61  ;;  %v884_v6 = vadd.f32 %v1699_v2, %v371_v63 }
 0x163   : > { %v1653_v8 = vpop.f32.mrf.mxu0  ;;  %v1701_v10 = vpop.f32.mrf.mxu1 }
 0x164   : > { %900 = vst [vmem:[#allocation2] sm:$0xff] %v868_v5  ;;  %916 = vst [vmem:[#allocation2 + $0x58] sm:$0xff] %v884_v6  ;;  %v1654_v11 = vadd.f32 %v1653_v8, %v1652_v3  ;;  %v1702_v12 = vadd.f32 %v1701_v10, %v1700_v4  ;;  %v362_v3 = vld [vmem:[#allocation2 + $0x80] sm:$0xff]  ;;  %v378_v5 = vld [vmem:[#allocation2 + $0xa8] sm:$0xff] }
 0x165   : > { %v1655_v13 = vpop.f32.mrf.mxu0  ;;  %v1703_v14 = vpop.f32.mrf.mxu1 }
 0x166   : > { %v869_v15 = vadd.f32 %v1654_v11, %v356_v7  ;;  %v885_v16 = vadd.f32 %v1702_v12, %v372_v9 }
 0x167   : > { %v1656_v18 = vpop.f32.mrf.mxu0  ;;  %v1704_v20 = vpop.f32.mrf.mxu1 }
 0x168   : > { %901 = vst [vmem:[#allocation2 + $0xd8] sm:$0xff] %v869_v15  ;;  %917 = vst [vmem:[#allocation2 + $0x40] sm:$0xff] %v885_v16  ;;  %v1657_v21 = vadd.f32 %v1656_v18, %v1655_v13  ;;  %v1705_v22 = vadd.f32 %v1704_v20, %v1703_v14  ;;  %v363_v13 = vld [vmem:[#allocation2 + $0x88] sm:$0xff]  ;;  %v379_v15 = vld [vmem:[#allocation2 + $0xd0] sm:$0xff] }
 0x169   : > { %v1658_v23 = vpop.f32.mrf.mxu0  ;;  %v1706_v24 = vpop.f32.mrf.mxu1 }
 0x16a   : > { %v870_v25 = vadd.f32 %v1657_v21, %v357_v17  ;;  %v886_v26 = vadd.f32 %v1705_v22, %v373_v19 }
 0x16b   : > { %v1659_v28 = vpop.f32.mrf.mxu0  ;;  %v1707_v30 = vpop.f32.mrf.mxu1 }
 0x16c   : > { %902 = vst [vmem:[#allocation2 + $0x18] sm:$0xff] %v870_v25  ;;  %918 = vst [vmem:[#allocation2 + $0xc8] sm:$0xff] %v886_v26  ;;  %v1660_v31 = vadd.f32 %v1659_v28, %v1658_v23  ;;  %v1708_v32 = vadd.f32 %v1707_v30, %v1706_v24  ;;  %v364_v23 = vld [vmem:[#allocation2 + $0xe8] sm:$0xff]  ;;  %v380_v25 = vld [vmem:[#allocation2 + $0x10] sm:$0xff] }
 0x16d   : > { %v1661_v33 = vpop.f32.mrf.mxu0  ;;  %v1709_v34 = vpop.f32.mrf.mxu1 }
 0x16e   : > { %v871_v35 = vadd.f32 %v1660_v31, %v358_v27  ;;  %v887_v36 = vadd.f32 %v1708_v32, %v374_v29 }
 0x16f   : > { %v1662_v38 = vpop.f32.mrf.mxu0  ;;  %v1710_v40 = vpop.f32.mrf.mxu1 }
 0x170   : > { %903 = vst [vmem:[#allocation2 + $0x50] sm:$0xff] %v871_v35  ;;  %919 = vst [vmem:[#allocation2 + $0xe0] sm:$0xff] %v887_v36  ;;  %v1663_v41 = vadd.f32 %v1662_v38, %v1661_v33  ;;  %v1711_v42 = vadd.f32 %v1710_v40, %v1709_v34  ;;  %v365_v33 = vld [vmem:[#allocation2 + $0xb8] sm:$0xff]  ;;  %v381_v35 = vld [vmem:[#allocation2 + $0x28] sm:$0xff] }
 0x171   : > { %v1664_v43 = vpop.f32.mrf.mxu0  ;;  %v1712_v44 = vpop.f32.mrf.mxu1 }
 0x172   : > { %v872_v45 = vadd.f32 %v1663_v41, %v359_v37  ;;  %v888_v46 = vadd.f32 %v1711_v42, %v375_v39 }
 0x173   : > { %v1665_v48 = vpop.f32.mrf.mxu0  ;;  %v1713_v50 = vpop.f32.mrf.mxu1 }
 0x174   : > { %904 = vst [vmem:[#allocation2 + $0x68] sm:$0xff] %v872_v45  ;;  %920 = vst [vmem:[#allocation2 + $0x90] sm:$0xff] %v888_v46  ;;  %v1666_v51 = vadd.f32 %v1665_v48, %v1664_v43  ;;  %v1714_v52 = vadd.f32 %v1713_v50, %v1712_v44  ;;  %v366_v43 = vld [vmem:[#allocation2 + $0x60] sm:$0xff] }
 0x175   : > { %v1667_v53 = vpop.f32.mrf.mxu0  ;;  %v1715_v54 = vpop.f32.mrf.mxu1  ;;  %v382_v45 = vld [vmem:[#allocation2 + $0xa0] sm:$0xff] }
 0x176   : > { %v873_v55 = vadd.f32 %v1666_v51, %v360_v47  ;;  %v889_v56 = vadd.f32 %v1714_v52, %v376_v49 }
 0x177   : > { %v1668_v58 = vpop.f32.mrf.mxu0  ;;  %v1716_v60 = vpop.f32.mrf.mxu1 }
 0x178   : > { %905 = vst [vmem:[#allocation2 + $0x30] sm:$0xff] %v873_v55  ;;  %921 = vst [vmem:[#allocation2 + $0x70] sm:$0xff] %v889_v56  ;;  %v1669_v61 = vadd.f32 %v1668_v58, %v1667_v53  ;;  %v1717_v62 = vadd.f32 %v1716_v60, %v1715_v54  ;;  %v367_v53 = vld [vmem:[#allocation2 + $0xf0] sm:$0xff]  ;;  %v383_v55 = vld [vmem:[#allocation2 + $0xf8] sm:$0xff] }
 0x179   : > { %v1670_v63 = vpop.f32.mrf.mxu0  ;;  %v1718_v0 = vpop.f32.mrf.mxu1 }
 0x17a   : > { %v874_v1 = vadd.f32 %v1669_v61, %v361_v57  ;;  %v890_v2 = vadd.f32 %v1717_v62, %v377_v59 }
 0x17b   : > { %v1671_v4 = vpop.f32.mrf.mxu0  ;;  %v1719_v6 = vpop.f32.mrf.mxu1 }
 0x17c   : > { %906 = vst [vmem:[#allocation2 + $0x48] sm:$0xff] %v874_v1  ;;  %922 = vst [vmem:[#allocation2 + $0xc0] sm:$0xff] %v890_v2  ;;  %v1672_v7 = vadd.f32 %v1671_v4, %v1670_v63  ;;  %v1720_v8 = vadd.f32 %v1719_v6, %v1718_v0  ;;  %v368_v63 = vld [vmem:[#allocation2 + $0x8] sm:$0xff]  ;;  %v384_v1 = vld [vmem:[#allocation2 + $0x20] sm:$0xff] }
 0x17d   : > { %v1673_v9 = vpop.f32.mrf.mxu0  ;;  %v1721_v10 = vpop.f32.mrf.mxu1 }
 0x17e   : > { %v875_v11 = vadd.f32 %v1672_v7, %v362_v3  ;;  %v891_v12 = vadd.f32 %v1720_v8, %v378_v5 }
 0x17f   : > { %v1674_v14 = vpop.f32.mrf.mxu0  ;;  %v1722_v16 = vpop.f32.mrf.mxu1 }
 0x180   : > { %907 = vst [vmem:[#allocation2 + $0x80] sm:$0xff] %v875_v11  ;;  %923 = vst [vmem:[#allocation2 + $0xa8] sm:$0xff] %v891_v12  ;;  %v1675_v17 = vadd.f32 %v1674_v14, %v1673_v9  ;;  %v1723_v18 = vadd.f32 %v1722_v16, %v1721_v10  ;;  %v369_v9 = vld [vmem:[#allocation2 + $0x78] sm:$0xff] }
 0x181   : > { %v1676_v19 = vpop.f32.mrf.mxu0  ;;  %v1724_v20 = vpop.f32.mrf.mxu1  ;;  %v385_v11 = vld [vmem:[#allocation2 + $0x98] sm:$0xff] }
 0x182   : > { %v876_v21 = vadd.f32 %v1675_v17, %v363_v13  ;;  %v892_v22 = vadd.f32 %v1723_v18, %v379_v15 }
 0x183   : > { %v1677_v24 = vpop.f32.mrf.mxu0  ;;  %v1725_v26 = vpop.f32.mrf.mxu1 }
 0x184   : > { %908 = vst [vmem:[#allocation2 + $0x88] sm:$0xff] %v876_v21  ;;  %924 = vst [vmem:[#allocation2 + $0xd0] sm:$0xff] %v892_v22  ;;  %v1678_v27 = vadd.f32 %v1677_v24, %v1676_v19  ;;  %v1726_v28 = vadd.f32 %v1725_v26, %v1724_v20 }
 0x185   : > { %v1679_v29 = vpop.f32.mrf.mxu0  ;;  %v1727_v30 = vpop.f32.mrf.mxu1 }
 0x186   : > { %v877_v31 = vadd.f32 %v1678_v27, %v364_v23  ;;  %v893_v32 = vadd.f32 %v1726_v28, %v380_v25 }
 0x187   : > { %v1680_v34 = vpop.f32.mrf.mxu0  ;;  %v1728_v36 = vpop.f32.mrf.mxu1 }
 0x188   : > { %909 = vst [vmem:[#allocation2 + $0xe8] sm:$0xff] %v877_v31  ;;  %925 = vst [vmem:[#allocation2 + $0x10] sm:$0xff] %v893_v32  ;;  %v1681_v37 = vadd.f32 %v1680_v34, %v1679_v29  ;;  %v1729_v38 = vadd.f32 %v1728_v36, %v1727_v30 }
 0x189   : > { %v1682_v39 = vpop.f32.mrf.mxu0  ;;  %v1730_v40 = vpop.f32.mrf.mxu1 }
 0x18a   : > { %v878_v41 = vadd.f32 %v1681_v37, %v365_v33  ;;  %v894_v42 = vadd.f32 %v1729_v38, %v381_v35 }
 0x18b   : > { %v1683_v44 = vpop.f32.mrf.mxu0  ;;  %v1731_v46 = vpop.f32.mrf.mxu1 }
 0x18c   : > { %910 = vst [vmem:[#allocation2 + $0xb8] sm:$0xff] %v878_v41  ;;  %926 = vst [vmem:[#allocation2 + $0x28] sm:$0xff] %v894_v42  ;;  %v1684_v47 = vadd.f32 %v1683_v44, %v1682_v39  ;;  %v1732_v48 = vadd.f32 %v1731_v46, %v1730_v40 }
 0x18d   : > { %v1685_v49 = vpop.f32.mrf.mxu0  ;;  %v1733_v50 = vpop.f32.mrf.mxu1 }
 0x18e   : > { %v879_v51 = vadd.f32 %v1684_v47, %v366_v43  ;;  %v895_v52 = vadd.f32 %v1732_v48, %v382_v45 }
 0x18f   : > { %v1686_v54 = vpop.f32.mrf.mxu0  ;;  %v1734_v56 = vpop.f32.mrf.mxu1 }
 0x190   : > { %911 = vst [vmem:[#allocation2 + $0x60] sm:$0xff] %v879_v51  ;;  %927 = vst [vmem:[#allocation2 + $0xa0] sm:$0xff] %v895_v52  ;;  %v1687_v57 = vadd.f32 %v1686_v54, %v1685_v49  ;;  %v1735_v58 = vadd.f32 %v1734_v56, %v1733_v50 }
 0x191   : > { %v1688_v59 = vpop.f32.mrf.mxu0  ;;  %v1736_v60 = vpop.f32.mrf.mxu1 }
 0x192   : > { %v880_v61 = vadd.f32 %v1687_v57, %v367_v53  ;;  %v896_v62 = vadd.f32 %v1735_v58, %v383_v55 }
 0x193   : > { %v1689_v0 = vpop.f32.mrf.mxu0  ;;  %v1737_v2 = vpop.f32.mrf.mxu1 }
 0x194   : > { %912 = vst [vmem:[#allocation2 + $0xf0] sm:$0xff] %v880_v61  ;;  %928 = vst [vmem:[#allocation2 + $0xf8] sm:$0xff] %v896_v62  ;;  %v1690_v3 = vadd.f32 %v1689_v0, %v1688_v59  ;;  %v1738_v4 = vadd.f32 %v1737_v2, %v1736_v60 }
 0x195   : > { %v1691_v5 = vpop.f32.mrf.mxu0  ;;  %v1739_v6 = vpop.f32.mrf.mxu1 }
 0x196   : > { %v881_v7 = vadd.f32 %v1690_v3, %v368_v63  ;;  %v897_v8 = vadd.f32 %v1738_v4, %v384_v1 }
 0x197   : > { %v1692_v10 = vpop.f32.mrf.mxu0  ;;  %v1740_v12 = vpop.f32.mrf.mxu1 }
 0x198   : > { %913 = vst [vmem:[#allocation2 + $0x8] sm:$0xff] %v881_v7  ;;  %929 = vst [vmem:[#allocation2 + $0x20] sm:$0xff] %v897_v8  ;;  %v1693_v13 = vadd.f32 %v1692_v10, %v1691_v5  ;;  %v1741_v14 = vadd.f32 %v1740_v12, %v1739_v6  ;;  %934 = sbr.rel (%p1460_p1) target bundleno = 449 (0x1c1), region = 52 }
 0x19a   : > { %v882_v15 = vadd.f32 %v1693_v13, %v369_v9  ;;  %v898_v16 = vadd.f32 %v1741_v14, %v385_v11 }
 0x19c   : > { %914 = vst [vmem:[#allocation2 + $0x78] sm:$0xff] %v882_v15  ;;  %930 = vst [vmem:[#allocation2 + $0x98] sm:$0xff] %v898_v16 }
 0x19d   : > { %v935_v17 = vld [vmem:[#allocation2 + $0xb0] sm:$0xff]  ;;  %v936_v18 = vld [vmem:[#allocation2] sm:$0xff]  ;;  %v937_v23 = vld [vmem:[#allocation2 + $0xd8] sm:$0xff] }
 0x19e   : > { %v2464_v19 = vld [vmem:[%s2669_s4] ss:$0 sm:$0xff]  ;;  %v938_v24 = vld [vmem:[#allocation2 + $0x18] sm:$0xff]  ;;  %v939_v27 = vld [vmem:[#allocation2 + $0x50] sm:$0xff] }
 0x19f   : > { %v974_v20 = vmul.f32 %v2464_v19, %v935_v17  ;;  %v975_v21 = vmul.f32 %v2464_v19, %v936_v18  ;;  %v2471_v22 = vld [vmem:[%s2670_s27] ss:$0 sm:$0xff]  ;;  %v976_v25 = vmul.f32 %v2464_v19, %v937_v23  ;;  %v977_v26 = vmul.f32 %v2464_v19, %v938_v24  ;;  %v940_v28 = vld [vmem:[#allocation2 + $0x68] sm:$0xff]  ;;  %v941_v29 = vld [vmem:[#allocation2 + $0x30] sm:$0xff] }
 0x1a0   : > { %v978_v32 = vmul.f32 %v2464_v19, %v939_v27  ;;  %v979_v33 = vmul.f32 %v2464_v19, %v940_v28  ;;  %v942_v34 = vld [vmem:[#allocation2 + $0x48] sm:$0xff]  ;;  %v980_v37 = vmul.f32 %v2464_v19, %v941_v29  ;;  %v943_v39 = vld [vmem:[#allocation2 + $0x80] sm:$0xff]  ;;  %v946_v50 = vld [vmem:[#allocation2 + $0xb8] sm:$0xff] }
 0x1a1   : > { %v1013_v30 = vadd.f32 %v2471_v22, %v974_v20  ;;  %v1014_v31 = vadd.f32 %v2471_v22, %v975_v21  ;;  %v1015_v35 = vadd.f32 %v2471_v22, %v976_v25  ;;  %v1016_v36 = vadd.f32 %v2471_v22, %v977_v26  ;;  %v944_v44 = vld [vmem:[#allocation2 + $0x88] sm:$0xff]  ;;  %v947_v55 = vld [vmem:[#allocation2 + $0x60] sm:$0xff]  ;;  %v948_v56 = vld [vmem:[#allocation2 + $0xf0] sm:$0xff] }
 0x1a2   : > { %v981_v38 = vmul.f32 %v2464_v19, %v942_v34  ;;  %v1017_v42 = vadd.f32 %v2471_v22, %v978_v32  ;;  %v1018_v43 = vadd.f32 %v2471_v22, %v979_v33  ;;  %v1019_v47 = vadd.f32 %v2471_v22, %v980_v37  ;;  %v945_v49 = vld [vmem:[#allocation2 + $0xe8] sm:$0xff]  ;;  %v951_v7 = vld [vmem:[#allocation2 + $0x38] sm:$0xff]  ;;  %v953_v23 = vld [vmem:[#allocation2 + $0x40] sm:$0xff] }
 0x1a3   : > { %v1045_v40 = vmax.f32 %v1013_v30, 0.0  ;;  %v1046_v41 = vmax.f32 %v1014_v31, 0.0  ;;  %v1047_v45 = vmax.f32 %v1015_v35, 0.0  ;;  %v1048_v46 = vmax.f32 %v1016_v36, 0.0  ;;  %v949_v61 = vld [vmem:[#allocation2 + $0x8] sm:$0xff]  ;;  %v950_v2 = vld [vmem:[#allocation2 + $0x78] sm:$0xff] }
 0x1a4   : > { %v1020_v48 = vadd.f32 %v2471_v22, %v981_v38  ;;  %v1049_v52 = vmax.f32 %v1017_v42, 0.0  ;;  %v1050_v53 = vmax.f32 %v1018_v43, 0.0  ;;  %v982_v54 = vmul.f32 %v2464_v19, %v943_v39  ;;  %v952_v16 = vld [vmem:[#allocation2 + $0x58] sm:$0xff]  ;;  %v954_v24 = vld [vmem:[#allocation2 + $0xc8] sm:$0xff]  ;;  %v955_v29 = vld [vmem:[#allocation2 + $0xe0] sm:$0xff] }
 0x1a5   : > { %v1538_v51 = vpack.c.bf16 %v1046_v41, %v1045_v40  ;;  %v1543_v57 = vpack.c.bf16 %v1048_v46, %v1047_v45  ;;  %v1051_v58 = vmax.f32 %v1019_v47, 0.0  ;;  %v983_v60 = vmul.f32 %v2464_v19, %v944_v44  ;;  %v956_v30 = vld [vmem:[#allocation2 + $0x90] sm:$0xff]  ;;  %v958_v40 = vld [vmem:[#allocation2 + $0xc0] sm:$0xff]  ;;  %v959_v45 = vld [vmem:[#allocation2 + $0xa8] sm:$0xff] }
 0x1a6   : > { %v1052_v59 = vmax.f32 %v1020_v48, 0.0  ;;  %v1548_v62 = vpack.c.bf16 %v1050_v53, %v1049_v52  ;;  %v1021_v63 = vadd.f32 %v2471_v22, %v982_v54  ;;  %v984_v0 = vmul.f32 %v2464_v19, %v945_v49  ;;  %v957_v35 = vld [vmem:[#allocation2 + $0x70] sm:$0xff] }
 0x1a7   : > { %1539 = vst [vmem:[%s2409_s25] sm:$0xff] %v1538_v51   ;;  %v985_v1 = vmul.f32 %v2464_v19, %v946_v50  ;;  %1615 = vst [vmem:[%s2409_s25 + $0x8] sm:$0xff] %v1543_v57   ;;  %v1022_v4 = vadd.f32 %v2471_v22, %v983_v60  ;;  %v986_v5 = vmul.f32 %v2464_v19, %v947_v55  ;;  %v960_v54 = vld [vmem:[#allocation2 + $0xd0] sm:$0xff]  ;;  %v962_v60 = vld [vmem:[#allocation2 + $0x28] sm:$0xff] }
 0x1a8   : > { %v1553_v3 = vpack.c.bf16 %v1052_v59, %v1051_v58  ;;  %v987_v6 = vmul.f32 %v2464_v19, %v948_v56  ;;  %1616 = vst [vmem:[%s2409_s25 + $0x10] sm:$0xff] %v1548_v62   ;;  %v1053_v8 = vmax.f32 %v1021_v63, 0.0  ;;  %v1023_v9 = vadd.f32 %v2471_v22, %v984_v0  ;;  %v961_v59 = vld [vmem:[#allocation2 + $0x10] sm:$0xff] }
 0x1a9   : > { %v1024_v10 = vadd.f32 %v2471_v22, %v985_v1  ;;  %v988_v11 = vmul.f32 %v2464_v19, %v949_v61  ;;  %v1054_v12 = vmax.f32 %v1022_v4, 0.0  ;;  %v1025_v13 = vadd.f32 %v2471_v22, %v986_v5  ;;  %v963_v1 = vld [vmem:[#allocation2 + $0xa0] sm:$0xff] }
 0x1aa   : > { %1617 = vst [vmem:[%s2409_s25 + $0x18] sm:$0xff] %v1553_v3   ;;  %v1026_v14 = vadd.f32 %v2471_v22, %v987_v6  ;;  %v989_v15 = vmul.f32 %v2464_v19, %v950_v2  ;;  %v1055_v17 = vmax.f32 %v1023_v9, 0.0  ;;  %v990_v21 = vmul.f32 %v2464_v19, %v951_v7  ;;  %v964_v2 = vld [vmem:[#allocation2 + $0xf8] sm:$0xff]  ;;  %v965_v7 = vld [vmem:[#allocation2 + $0x20] sm:$0xff] }
 0x1ab   : > { %v1056_v18 = vmax.f32 %v1024_v10, 0.0  ;;  %v1027_v20 = vadd.f32 %v2471_v22, %v988_v11  ;;  %v1558_v25 = vpack.c.bf16 %v1054_v12, %v1053_v8  ;;  %v1057_v26 = vmax.f32 %v1025_v13, 0.0  ;;  %v966_v12 = vld [vmem:[#allocation2 + $0x98] sm:$0xff] }
 0x1ac   : > { %v1058_v27 = vmax.f32 %v1026_v14, 0.0  ;;  %v1028_v28 = vadd.f32 %v2471_v22, %v989_v15  ;;  %v991_v33 = vmul.f32 %v2464_v19, %v952_v16  ;;  %v1029_v34 = vadd.f32 %v2471_v22, %v990_v21 }
 0x1ad   : > { %v1563_v31 = vpack.c.bf16 %v1056_v18, %v1055_v17  ;;  %v1059_v32 = vmax.f32 %v1027_v20, 0.0  ;;  %1618 = vst [vmem:[%s2409_s25 + $0x20] sm:$0xff] %v1558_v25   ;;  %v992_v38 = vmul.f32 %v2464_v19, %v953_v23  ;;  %v993_v39 = vmul.f32 %v2464_v19, %v954_v24 }
 0x1ae   : > { %v1568_v36 = vpack.c.bf16 %v1058_v27, %v1057_v26  ;;  %v1060_v37 = vmax.f32 %v1028_v28, 0.0  ;;  %v1030_v41 = vadd.f32 %v2471_v22, %v991_v33  ;;  %v1061_v42 = vmax.f32 %v1029_v34, 0.0 }
 0x1af   : > { %1619 = vst [vmem:[%s2409_s25 + $0x28] sm:$0xff] %v1563_v31   ;;  %v994_v43 = vmul.f32 %v2464_v19, %v955_v29  ;;  %v995_v44 = vmul.f32 %v2464_v19, %v956_v30  ;;  %v1031_v47 = vadd.f32 %v2471_v22, %v992_v38  ;;  %v1032_v48 = vadd.f32 %v2471_v22, %v993_v39 }
 0x1b0   : > { %1620 = vst [vmem:[%s2409_s25 + $0x30] sm:$0xff] %v1568_v36   ;;  %v1573_v46 = vpack.c.bf16 %v1060_v37, %v1059_v32  ;;  %v996_v49 = vmul.f32 %v2464_v19, %v957_v35  ;;  %v1062_v50 = vmax.f32 %v1030_v41, 0.0  ;;  %v997_v53 = vmul.f32 %v2464_v19, %v958_v40 }
 0x1b1   : > { %v1033_v51 = vadd.f32 %v2471_v22, %v994_v43  ;;  %v1034_v52 = vadd.f32 %v2471_v22, %v995_v44  ;;  %v1063_v55 = vmax.f32 %v1031_v47, 0.0  ;;  %v1064_v56 = vmax.f32 %v1032_v48, 0.0 }
 0x1b2   : > { %1621 = vst [vmem:[%s2409_s25 + $0x38] sm:$0xff] %v1573_v46   ;;  %v1035_v57 = vadd.f32 %v2471_v22, %v996_v49  ;;  %v998_v58 = vmul.f32 %v2464_v19, %v959_v45  ;;  %v1578_v61 = vpack.c.bf16 %v1062_v50, %v1061_v42  ;;  %v1036_v0 = vadd.f32 %v2471_v22, %v997_v53 }
 0x1b3   : > { %v1065_v62 = vmax.f32 %v1033_v51, 0.0  ;;  %v1066_v63 = vmax.f32 %v1034_v52, 0.0  ;;  %v1583_v3 = vpack.c.bf16 %v1064_v56, %v1063_v55  ;;  %v999_v5 = vmul.f32 %v2464_v19, %v960_v54 }
 0x1b4   : > { %v1067_v4 = vmax.f32 %v1035_v57, 0.0  ;;  %v1037_v6 = vadd.f32 %v2471_v22, %v998_v58  ;;  %1622 = vst [vmem:[%s2409_s25 + $0x40] sm:$0xff] %v1578_v61   ;;  %v1068_v9 = vmax.f32 %v1036_v0, 0.0  ;;  %v1000_v10 = vmul.f32 %v2464_v19, %v961_v59 }
 0x1b5   : > { %v1588_v8 = vpack.c.bf16 %v1066_v63, %v1065_v62  ;;  %v1001_v11 = vmul.f32 %v2464_v19, %v962_v60  ;;  %1623 = vst [vmem:[%s2409_s25 + $0x48] sm:$0xff] %v1583_v3   ;;  %v1038_v13 = vadd.f32 %v2471_v22, %v999_v5  ;;  %v1002_v15 = vmul.f32 %v2464_v19, %v963_v1 }
 0x1b6   : > { %v1069_v14 = vmax.f32 %v1037_v6, 0.0  ;;  %v1003_v16 = vmul.f32 %v2464_v19, %v964_v2  ;;  %v1593_v17 = vpack.c.bf16 %v1068_v9, %v1067_v4  ;;  %v1039_v18 = vadd.f32 %v2471_v22, %v1000_v10 }
 0x1b7   : > { %1624 = vst [vmem:[%s2409_s25 + $0x50] sm:$0xff] %v1588_v8   ;;  %v1040_v20 = vadd.f32 %v2471_v22, %v1001_v11  ;;  %v1004_v21 = vmul.f32 %v2464_v19, %v965_v7  ;;  %v1070_v23 = vmax.f32 %v1038_v13, 0.0  ;;  %v1041_v24 = vadd.f32 %v2471_v22, %v1002_v15 }
 0x1b8   : > { %v1042_v25 = vadd.f32 %v2471_v22, %v1003_v16  ;;  %v1005_v26 = vmul.f32 %v2464_v19, %v966_v12  ;;  %1625 = vst [vmem:[%s2409_s25 + $0x58] sm:$0xff] %v1593_v17   ;;  %v1071_v27 = vmax.f32 %v1039_v18, 0.0 }
 0x1b9   : > { %v1072_v28 = vmax.f32 %v1040_v20, 0.0  ;;  %v1043_v29 = vadd.f32 %v2471_v22, %v1004_v21  ;;  %v1598_v30 = vpack.c.bf16 %v1070_v23, %v1069_v14  ;;  %v1073_v31 = vmax.f32 %v1041_v24, 0.0 }
 0x1ba   : > { %v1074_v32 = vmax.f32 %v1042_v25, 0.0  ;;  %v1044_v33 = vadd.f32 %v2471_v22, %v1005_v26 }
 0x1bb   : > { %v1603_v34 = vpack.c.bf16 %v1072_v28, %v1071_v27  ;;  %v1075_v35 = vmax.f32 %v1043_v29, 0.0  ;;  %1626 = vst [vmem:[%s2409_s25 + $0x60] sm:$0xff] %v1598_v30  }
 0x1bc   : > { %v1608_v36 = vpack.c.bf16 %v1074_v32, %v1073_v31  ;;  %v1076_v37 = vmax.f32 %v1044_v33, 0.0 }
 0x1bd   : > { %1627 = vst [vmem:[%s2409_s25 + $0x68] sm:$0xff] %v1603_v34  }
 0x1be   : > { %1628 = vst [vmem:[%s2409_s25 + $0x70] sm:$0xff] %v1608_v36   ;;  %v1613_v38 = vpack.c.bf16 %v1076_v37, %v1075_v35 }
 0x1c0   : > { %1629 = vst [vmem:[%s2409_s25 + $0x78] sm:$0xff] %v1613_v38  }
 0x1c1 PF: > { %s2671_s7 = sld [smem:[#allocation13_spill]]  ;;  %s1252_s30 = sshll.u32 %s2409_s25, 4  ;;  %s2558_s30 = int_to_ptr.vmem [resolvable:$true] %s1252_s30 }
 0x1c2   : > { %s2672_s12 = sld [smem:[#allocation20_spill]]  ;;  %s2562_s6 = scalar_lea.sflag [#allocation5], %s304_s9 }
 0x1c3   : > { %s2017_s2 = scalar_lea.vmem %s2558_s30, 2048  ;;  %s2175_s8 = smov [#allocation8]  }
 0x1c4   : > { %p2018_p3 = scmp.ne.s32.totalorder %s2558_s30, %s2017_s2  ;;  %s2021_s4 = sshll.u32 %s2175_s8, 4  ;;  %s2022_s4 = int_to_ptr.vmem [resolvable:$false] %s2021_s4 }
 0x1c5   : > { %s2023_s18 = scalar_lea.vmem %s2022_s4, 4096  ;;  %p2024_p12 = scmp.lt.s32.totalorder %s2558_s30, %s2022_s4 }
 0x1c6   : > { %p2019_p13 = pnand %p2018_p3, %p2365_p6  ;;  %p2025_p0 = scmp.lt.s32.totalorder %s2023_s18, %s2017_s2 }
 0x1c7   : > { %s1534_s0 = sshll.u32 %s2671_s7, 11 }
 0x1c8   : > { %s2555_s11 = scalar_lea.hbm %s2672_s12, %s1534_s0  ;;  %p2020_p2 = pneg %p2019_p13 }
 0x1c9   : > { %p2026_p9 = por %p2025_p0, %p2024_p12 }
 0x1cb   : > { %p2027_p4 = pnand %p2026_p9, %p2020_p2 }
 0x1cd   : > { %2030 = shalt.err (!%p2027_p4)
}
 0x1ce   : > { %s2031_s9 = scalar_lea.hbm %s2555_s11, 2048  ;;  %s2035_s27 = scalar_lea.hbm %s2672_s12, 8192 }
 0x1cf   : > { %p2032_p7 = scmp.ne.s32.totalorder %s2555_s11, %s2031_s9  ;;  %p2036_p10 = scmp.lt.s32.totalorder %s2555_s11, %s2672_s12 }
 0x1d0   : > { %p2037_p11 = scmp.lt.s32.totalorder %s2035_s27, %s2031_s9 }
 0x1d1   : > { %p2033_p5 = pnand %p2032_p7, %p2365_p6 }
 0x1d2   : > { %p2038_p1 = por %p2037_p11, %p2036_p10 }
 0x1d3   : > { %p2034_p8 = pneg %p2033_p5 }
 0x1d5   : > { %p2039_p3 = pnand %p2038_p1, %p2034_p8 }
 0x1d7   : > { %2042 = shalt.err (!%p2039_p3)
}
 0x1d8   : > { %s2176_s10 = smov 64   ;;  %s2177_s24 = smov 4  }
 0x1d9   : > { %1762 = dma.vmem_to_hbm [thread:$0]  (%p2365_p6), %s2558_s30, 2048, %s2555_s11, %s2562_s6, %s2176_s10, %s2176_s10, %s2177_s24  }
 0x1da PF: > { %p1776_p13 = scmp.ge.s32.totalorder %s2165_s28, 2  ;;  %s1267_s2 = sand.u32 1, %s2113_s15  }
 0x1db   : > { %p2673_p2 = scmp.ne.s32.totalorder %s2664_s5, 0  ;;  %s1268_s8 = scalar_lea.sflag [#allocation5], %s1267_s2 }
 0x1dd   : > { %p1772_p12 = pnand %p1776_p13, %p2673_p2 }
 0x1df   : > { %p1773_p0 = pneg %p1772_p12 }
 0x1e1   : > { %2108 = dma.done.wait (%p1773_p0), %s1268_s8, 2048  }
 0x1e2   : > { %2110 = vsyncadd (%p1773_p0), %s1268_s8, 4294965248  ;;  %s23_s28 = sadd.s32 1, %s2165_s28   ;;  %s2675_s25 = sld [smem:[#allocation14_spill]] }
 0x1e3   : > { %p2590_p9 = scmp.ge.s32.totalorder %s23_s28, 10   ;;  %s2676_s5 = sld [smem:[#allocation15_spill]] }
 0x1e4   : > { %s2677_s27 = sld [smem:[#allocation16_spill]]  ;;  %s2678_s15 = smov %s2117_s16 }
 0x1e5   : > { %s2679_s16 = smov %s2121_s17  ;;  %s2680_s17 = smov %s2303_s13 }
 0x1e6   : > { %s2681_s18 = smov %s2129_s19  ;;  %s2682_s19 = smov %s2133_s20 }
 0x1e7   : > { %s2683_s20 = smov %s2349_s3  ;;  %s2684_s21 = smov %s2141_s22 }
 0x1e8   : > { %s2685_s22 = smov %s2145_s23  ;;  %s2686_s23 = smov %s2306_s14 }
 0x1e9   : > { %s2687_s24 = smov %s2157_s26  ;;  %s2688_s26 = smov %s2676_s5 }
 0x1ea   :  { %22 = sbr.rel (!%p2590_p9) target bundleno = 17 (0x11), region = 108 }
 0x1ef   :  { %1273 = vsyncpa [#allocation4], 1 }
 0x1f0   :  { %1275 = vsyncpa [#allocation4 + $0x1], 1 }
 0x1f1   :  { %1276 = vsyncpa [#allocation7], 1 }
 0x1f2   :  { %1278 = vsyncpa [#allocation7 + $0x1], 1 }
 0x1f3   :  { %1279 = vsyncpa [#allocation5], 1 }
 0x1f4   :  { %1281 = vsyncpa [#allocation5 + $0x1], 1 }

</bundles_post_ra>
